<compile_context>
chip_gen: v6e
topology: v6e:2x2x1
jax: 0.10.0
libtpu: 0.0.40
codegen_flags: <defaults>
</compile_context>

<pallas_src>
import functools

import jax
import jax.numpy as jnp
from jax import lax
from jax.experimental import pallas as pl
from jax.experimental.pallas import tpu as pltpu

LN_EPS = 1e-5  # torch.nn.LayerNorm default


def _round_up(a, m):
    return (a + m - 1) // m * m


def _layer_norm(v, gamma_row, beta_row):
    # v: [N, d_in] f32; gamma_row/beta_row: [1, d_in] f32
    mu = jnp.mean(v, axis=-1, keepdims=True)
    var = jnp.mean((v - mu) ** 2, axis=-1, keepdims=True)
    return (v - mu) * lax.rsqrt(var + LN_EPS) * gamma_row + beta_row


def ffn_kernel(*refs, has_emotion, seq_len, tT, ThL, Hf, k1, k2, p2):
    if has_emotion:
        (x_ref, emo_ref, w1_ref, b1_ref, w2_ref, b2_ref,
         gamma_ref, beta_ref, o_ref) = refs
    else:
        (x_ref, w1_ref, b1_ref, w2_ref, b2_ref,
         gamma_ref, beta_ref, o_ref) = refs
        emo_ref = None

    gamma = gamma_ref[...]   # [1, d_in] f32
    beta = beta_ref[...]     # [1, d_in] f32
    b1 = b1_ref[...]         # [1, d_hid] f32
    b2 = b2_ref[...]         # [1, d_in] f32

    # Halo'd window of the zero-padded input for this time tile.
    jts = pl.multiple_of(pl.program_id(1) * tT, tT)          # window start (padded coords)
    raw = x_ref[pl.ds(jts, ThL), :].astype(jnp.float32)      # [ThL, d_in]
    residual = raw[Hf:Hf + tT, :]                            # raw x rows of this tile

    pre = raw
    if has_emotion:
        pre = pre + emo_ref[pl.ds(jts, ThL), :].astype(jnp.float32)

    # Pre-LayerNorm on the halo'd rows, then zero every row outside the real
    # sequence so the convs see exactly Conv1d's "same" zero padding.
    u = _layer_norm(pre, gamma, beta)
    pad_idx = jts + lax.broadcasted_iota(jnp.int32, (ThL, 1), 0)
    in_seq = (pad_idx >= Hf) & (pad_idx < Hf + seq_len)
    u = jnp.where(in_seq, u, 0.0).astype(jnp.bfloat16)       # bf16 MXU operand

    # Conv1d #1: k1 shifted [L1, d_in] @ [d_in, d_hid] matmuls (valid conv on halo).
    L1 = tT + k2 - 1
    acc1 = jnp.dot(u[0:L1, :], w1_ref[0], preferred_element_type=jnp.float32)
    for t in range(1, k1):
        acc1 = acc1 + jnp.dot(u[t:t + L1, :], w1_ref[t],
                              preferred_element_type=jnp.float32)
    h1 = jnp.maximum(acc1 + b1, 0.0)                         # bias fused with ReLU

    if k2 > 1:
        # rows of h1 outside the real sequence must be zero before conv #2
        g1 = (jts - p2) + lax.broadcasted_iota(jnp.int32, (L1, 1), 0)
        h1 = jnp.where((g1 >= 0) & (g1 < seq_len), h1, 0.0)
    h1 = h1.astype(jnp.bfloat16)                             # bf16 MXU operand

    # Conv1d #2.
    acc2 = jnp.dot(h1[0:tT, :], w2_ref[0], preferred_element_type=jnp.float32)
    for t in range(1, k2):
        acc2 = acc2 + jnp.dot(h1[t:t + tT, :], w2_ref[t],
                              preferred_element_type=jnp.float32)
    h2 = acc2 + b2

    # TODO(synk): dropout is identity here (eval-mode semantics).
    out = _layer_norm(h2 + residual, gamma, beta)
    o_ref[...] = out.astype(o_ref.dtype)


@functools.partial(jax.jit, static_argnames=("time_tile",))
def position_wise_ffn(x, w1, b1, w2, b2, gamma, beta, emotion=None, *,
                      time_tile=None):
    """x, emotion: [B, T, d_in]; w1: [k1, d_in, d_hid]; w2: [k2, d_hid, d_in]."""
    B, T, d_in = x.shape
    k1, _, d_hid = w1.shape
    k2 = w2.shape[0]
    # PyTorch Conv1d(padding=(k-1)//2) only preserves length for odd k.
    assert k1 % 2 == 1 and k2 % 2 == 1, "only odd kernel sizes supported"

    p1, q1 = (k1 - 1) // 2, (k1 - 1) - (k1 - 1) // 2
    p2, q2 = (k2 - 1) // 2, (k2 - 1) - (k2 - 1) // 2
    Hf, Hb = p1 + p2, q1 + q2          # halo rows needed before / after each tile

    if time_tile is None:
        time_tile = min(512, _round_up(T, 8))
    tT = max(8, _round_up(time_tile, 8))
    Tp = _round_up(T, tT)
    nT = Tp // tT
    Th = tT + Hf + Hb
    ThL = _round_up(Th, 8)             # sublane-aligned window load length
    Tpad = Hf + Tp + Hb + (ThL - Th)   # padded time extent in HBM
    pad_back = Tpad - Hf - T

    xp = jnp.pad(x, ((0, 0), (Hf, pad_back), (0, 0)))

    full_spec = pl.BlockSpec((None, Tpad, d_in), lambda b, j: (b, 0, 0))
    inputs = [xp]
    in_specs = [full_spec]
    if emotion is not None:
        ep = jnp.pad(emotion, ((0, 0), (Hf, pad_back), (0, 0)))
        inputs.append(ep)
        in_specs.append(full_spec)

    inputs += [
        w1.astype(jnp.bfloat16),
        b1.reshape(1, d_hid).astype(jnp.float32),
        w2.astype(jnp.bfloat16),
        b2.reshape(1, d_in).astype(jnp.float32),
        gamma.reshape(1, d_in).astype(jnp.float32),
        beta.reshape(1, d_in).astype(jnp.float32),
    ]
    in_specs += [
        pl.BlockSpec((k1, d_in, d_hid), lambda b, j: (0, 0, 0)),  # w1 taps (bf16)
        pl.BlockSpec((1, d_hid), lambda b, j: (0, 0)),            # b1
        pl.BlockSpec((k2, d_hid, d_in), lambda b, j: (0, 0, 0)),  # w2 taps (bf16)
        pl.BlockSpec((1, d_in), lambda b, j: (0, 0)),             # b2
        pl.BlockSpec((1, d_in), lambda b, j: (0, 0)),             # gamma
        pl.BlockSpec((1, d_in), lambda b, j: (0, 0)),             # beta
    ]

    kernel = functools.partial(
        ffn_kernel, has_emotion=emotion is not None, seq_len=T,
        tT=tT, ThL=ThL, Hf=Hf, k1=k1, k2=k2, p2=p2)

    out_full = pl.pallas_call(
        kernel,
        out_shape=jax.ShapeDtypeStruct((B, Tp, d_in), x.dtype),
        grid_spec=pltpu.PrefetchScalarGridSpec(
            num_scalar_prefetch=0,
            grid=(B, nT),
            in_specs=in_specs,
            out_specs=pl.BlockSpec((None, tT, d_in), lambda b, j: (b, j, 0)),
        ),
        compiler_params=pltpu.CompilerParams(
            dimension_semantics=("parallel", "parallel"),
            vmem_limit_bytes=48 * 1024 * 1024),
    )(*inputs)
    return out_full[:, :T, :]


def _reference(x, w1, b1, w2, b2, gamma, beta, emotion=None):
    # Pure-JAX reference with the same bf16-operand / f32-accumulate matmul math.
    def ln(v):
        mu = jnp.mean(v, axis=-1, keepdims=True)
        var = jnp.mean((v - mu) ** 2, axis=-1, keepdims=True)
        return (v - mu) / jnp.sqrt(var + LN_EPS) * gamma + beta

    def conv(v, w, b):  # v: [B, T, Cin], w: [k, Cin, Cout]
        k = w.shape[0]
        pad = (k - 1) // 2
        vp = jnp.pad(v, ((0, 0), (pad, k - 1 - pad), (0, 0)))
        T = v.shape[1]
        acc = sum(jnp.einsum('btc,cd->btd',
                             vp[:, j:j + T, :].astype(jnp.bfloat16),
                             w[j].astype(jnp.bfloat16),
                             preferred_element_type=jnp.float32)
                  for j in range(k))
        return acc + b

    h = ln(x if emotion is None else x + emotion)
    h = conv(jax.nn.relu(conv(h, w1, b1)), w2, b2)
    return ln(h + x)


if __name__ == "__main__":
    key = jax.random.PRNGKey(0)
    B, T, d_in, d_hid = 2, 40, 128, 256      # lane-dense channels; T=40 -> 3 tiles of 16
    kernel_size = (3, 1)                     # 'same' padding, odd kernels

    kx, ke, kw1, kb1, kw2, kb2, kg, kb = jax.random.split(key, 8)

    x = jax.random.normal(kx, (B, T, d_in), dtype=jnp.float32)
    emotion = 0.5 * jax.random.normal(ke, (B, T, d_in), dtype=jnp.float32)

    # Conv1d weights: PyTorch shape [Cout, Cin, k] -> tap-major [k, Cin, Cout].
    w1_pt = 0.1 * jax.random.normal(kw1, (d_hid, d_in, kernel_size[0]), jnp.float32)
    b1 = 0.1 * jax.random.normal(kb1, (d_hid,), jnp.float32)
    w2_pt = 0.1 * jax.random.normal(kw2, (d_in, d_hid, kernel_size[1]), jnp.float32)
    b2 = 0.1 * jax.random.normal(kb2, (d_in,), jnp.float32)
    w1 = jnp.transpose(w1_pt, (2, 1, 0))     # [k1, d_in, d_hid]
    w2 = jnp.transpose(w2_pt, (2, 1, 0))     # [k2, d_hid, d_in]

    gamma = 1.0 + 0.1 * jax.random.normal(kg, (d_in,), jnp.float32)
    beta = 0.1 * jax.random.normal(kb, (d_in,), jnp.float32)

    # time_tile=16 -> grid (B, 3): exercises halo handling and tail masking.
    out = position_wise_ffn(x, w1, b1, w2, b2, gamma, beta, time_tile=16)
    out = jax.block_until_ready(out)
    ref = _reference(x, w1, b1, w2, b2, gamma, beta)
    assert out.shape == (B, T, d_in)
    assert jnp.allclose(out, ref, atol=2e-3, rtol=2e-3), \
        float(jnp.max(jnp.abs(out - ref)))

    # Optional emotion_cross_attention_output path (added in-kernel).
    out_e = position_wise_ffn(x, w1, b1, w2, b2, gamma, beta,
                              emotion=emotion, time_tile=16)
    out_e = jax.block_until_ready(out_e)
    ref_e = _reference(x, w1, b1, w2, b2, gamma, beta, emotion=emotion)
    assert jnp.allclose(out_e, ref_e, atol=2e-3, rtol=2e-3), \
        float(jnp.max(jnp.abs(out_e - ref_e)))

    print("KERNEL_OK")
</pallas_src>

<mosaic_0001>
module attributes {stable_mosaic.version = 11 : i64} {
  func.func @ffn_kernel(%arg0: i32, %arg1: i32, %arg2: memref<1x56x128xf32, #tpu.memory_space<vmem>>, %arg3: memref<3x128x256xbf16, #tpu.memory_space<vmem>>, %arg4: memref<1x256xf32, #tpu.memory_space<vmem>>, %arg5: memref<1x256x128xbf16, #tpu.memory_space<vmem>>, %arg6: memref<1x128xf32, #tpu.memory_space<vmem>>, %arg7: memref<1x128xf32, #tpu.memory_space<vmem>>, %arg8: memref<1x128xf32, #tpu.memory_space<vmem>>, %arg9: memref<1x16x128xf32, #tpu.memory_space<vmem>>) attributes {dimension_semantics = [#tpu.dimension_semantics<parallel>, #tpu.dimension_semantics<parallel>], iteration_bounds = array<i64: 2, 3>, scalar_prefetch = 0 : i64, scratch_operands = 0 : i64, tpu.core_type = #tpu.core_type<tc>, window_params = [{transform_indices = @transform_0, window_bounds = array<i64: 1, 56, 128>}, {pipeline_mode = #tpu.pipeline_mode<synchronous>, transform_indices = @transform_1, window_bounds = array<i64: 3, 128, 256>}, {pipeline_mode = #tpu.pipeline_mode<synchronous>, transform_indices = @transform_2, window_bounds = array<i64: 1, 256>}, {pipeline_mode = #tpu.pipeline_mode<synchronous>, transform_indices = @transform_3, window_bounds = array<i64: 1, 256, 128>}, {pipeline_mode = #tpu.pipeline_mode<synchronous>, transform_indices = @transform_4, window_bounds = array<i64: 1, 128>}, {pipeline_mode = #tpu.pipeline_mode<synchronous>, transform_indices = @transform_5, window_bounds = array<i64: 1, 128>}, {pipeline_mode = #tpu.pipeline_mode<synchronous>, transform_indices = @transform_6, window_bounds = array<i64: 1, 128>}, {transform_indices = @transform_7, window_bounds = array<i64: 1, 16, 128>}]} {
    %c0 = arith.constant 0 : index
    %c0_0 = arith.constant 0 : index
    %0 = vector.load %arg7[%c0, %c0_0] : memref<1x128xf32, #tpu.memory_space<vmem>>, vector<1x128xf32>
    %c0_1 = arith.constant 0 : index
    %c0_2 = arith.constant 0 : index
    %1 = vector.load %arg8[%c0_1, %c0_2] : memref<1x128xf32, #tpu.memory_space<vmem>>, vector<1x128xf32>
    %c0_3 = arith.constant 0 : index
    %c0_4 = arith.constant 0 : index
    %2 = vector.load %arg4[%c0_3, %c0_4] : memref<1x256xf32, #tpu.memory_space<vmem>>, vector<1x256xf32>
    %c0_5 = arith.constant 0 : index
    %c0_6 = arith.constant 0 : index
    %3 = vector.load %arg6[%c0_5, %c0_6] : memref<1x128xf32, #tpu.memory_space<vmem>>, vector<1x128xf32>
    %c16_i32 = arith.constant 16 : i32
    %4 = arith.muli %arg1, %c16_i32 : i32
    %5 = tpu.assume_multiple %4, 16 : i32
    %c0_7 = arith.constant 0 : index
    %6 = arith.index_cast %5 : i32 to index
    %c0_8 = arith.constant 0 : index
    %7 = vector.load %arg2[%c0_7, %6, %c0_8] : memref<1x56x128xf32, #tpu.memory_space<vmem>>, vector<1x24x128xf32>
    %8 = vector.shape_cast %7 : vector<1x24x128xf32> to vector<24x128xf32>
    %9 = vector.extract_strided_slice %8 {offsets = [1, 0], sizes = [16, 128], strides = [1, 1]} : vector<24x128xf32> to vector<16x128xf32>
    %cst = arith.constant dense<0.000000e+00> : vector<24xf32>
    %10 = vector.multi_reduction <add>, %8, %cst [1] : vector<24x128xf32> to vector<24xf32>
    %11 = vector.shape_cast %10 : vector<24xf32> to vector<24x1xf32>
    %cst_9 = arith.constant 1.280000e+02 : f32
    %12 = vector.broadcast %cst_9 : f32 to vector<24x1xf32>
    %13 = arith.divf %11, %12 : vector<24x1xf32>
    %14 = vector.broadcast %13 : vector<24x1xf32> to vector<24x128xf32>
    %15 = arith.subf %8, %14 : vector<24x128xf32>
    %16 = arith.mulf %15, %15 : vector<24x128xf32>
    %cst_10 = arith.constant dense<0.000000e+00> : vector<24xf32>
    %17 = vector.multi_reduction <add>, %16, %cst_10 [1] : vector<24x128xf32> to vector<24xf32>
    %18 = vector.shape_cast %17 : vector<24xf32> to vector<24x1xf32>
    %cst_11 = arith.constant 1.280000e+02 : f32
    %19 = vector.broadcast %cst_11 : f32 to vector<24x1xf32>
    %20 = arith.divf %18, %19 : vector<24x1xf32>
    %21 = vector.broadcast %13 : vector<24x1xf32> to vector<24x128xf32>
    %22 = arith.subf %8, %21 : vector<24x128xf32>
    %cst_12 = arith.constant 9.99999974E-6 : f32
    %23 = vector.broadcast %cst_12 : f32 to vector<24x1xf32>
    %24 = arith.addf %20, %23 : vector<24x1xf32>
    %25 = math.rsqrt %24 : vector<24x1xf32>
    %26 = vector.broadcast %25 : vector<24x1xf32> to vector<24x128xf32>
    %27 = arith.mulf %22, %26 : vector<24x128xf32>
    %28 = vector.broadcast %0 : vector<1x128xf32> to vector<24x128xf32>
    %29 = arith.mulf %27, %28 : vector<24x128xf32>
    %30 = vector.broadcast %1 : vector<1x128xf32> to vector<24x128xf32>
    %31 = arith.addf %29, %30 : vector<24x128xf32>
    %32 = tpu.iota {dimensions = array<i32: 0>} : vector<24x1xi32>
    %33 = vector.broadcast %5 : i32 to vector<24x1xi32>
    %34 = arith.addi %33, %32 : vector<24x1xi32>
    %c1_i32 = arith.constant 1 : i32
    %35 = vector.broadcast %c1_i32 : i32 to vector<24x1xi32>
    %36 = arith.cmpi sge, %34, %35 : vector<24x1xi32>
    %c41_i32 = arith.constant 41 : i32
    %37 = vector.broadcast %c41_i32 : i32 to vector<24x1xi32>
    %38 = arith.cmpi slt, %34, %37 : vector<24x1xi32>
    %39 = arith.andi %36, %38 : vector<24x1xi1>
    %cst_13 = arith.constant 0.000000e+00 : f32
    %40 = vector.shape_cast %39 : vector<24x1xi1> to vector<24x1xi1>
    %41 = vector.broadcast %40 : vector<24x1xi1> to vector<24x128xi1>
    %42 = vector.broadcast %cst_13 : f32 to vector<24x128xf32>
    %43 = arith.select %41, %31, %42 : vector<24x128xi1>, vector<24x128xf32>
    %44 = arith.truncf %43 : vector<24x128xf32> to vector<24x128xbf16>
    %45 = vector.extract_strided_slice %44 {offsets = [0, 0], sizes = [16, 128], strides = [1, 1]} : vector<24x128xbf16> to vector<16x128xbf16>
    %c0_14 = arith.constant 0 : index
    %c0_15 = arith.constant 0 : index
    %c0_16 = arith.constant 0 : index
    %46 = vector.load %arg3[%c0_14, %c0_15, %c0_16] : memref<3x128x256xbf16, #tpu.memory_space<vmem>>, vector<1x128x256xbf16>
    %47 = vector.shape_cast %46 : vector<1x128x256xbf16> to vector<128x256xbf16>
    %cst_17 = arith.constant dense<0.000000e+00> : vector<16x256xf32>
    %48 = tpu.matmul %45, %47, %cst_17 {dimension_numbers = #tpu.dot_dimension_numbers<[1], [0], [0], [1], [0, 0, 1, 1], [], []>} : vector<16x128xbf16>, vector<128x256xbf16>, vector<16x256xf32> -> vector<16x256xf32>
    %49 = vector.extract_strided_slice %44 {offsets = [1, 0], sizes = [16, 128], strides = [1, 1]} : vector<24x128xbf16> to vector<16x128xbf16>
    %c1 = arith.constant 1 : index
    %c0_18 = arith.constant 0 : index
    %c0_19 = arith.constant 0 : index
    %50 = vector.load %arg3[%c1, %c0_18, %c0_19] : memref<3x128x256xbf16, #tpu.memory_space<vmem>>, vector<1x128x256xbf16>
    %51 = vector.shape_cast %50 : vector<1x128x256xbf16> to vector<128x256xbf16>
    %cst_20 = arith.constant dense<0.000000e+00> : vector<16x256xf32>
    %52 = tpu.matmul %49, %51, %cst_20 {dimension_numbers = #tpu.dot_dimension_numbers<[1], [0], [0], [1], [0, 0, 1, 1], [], []>} : vector<16x128xbf16>, vector<128x256xbf16>, vector<16x256xf32> -> vector<16x256xf32>
    %53 = arith.addf %48, %52 : vector<16x256xf32>
    %54 = vector.extract_strided_slice %44 {offsets = [2, 0], sizes = [16, 128], strides = [1, 1]} : vector<24x128xbf16> to vector<16x128xbf16>
    %c2 = arith.constant 2 : index
    %c0_21 = arith.constant 0 : index
    %c0_22 = arith.constant 0 : index
    %55 = vector.load %arg3[%c2, %c0_21, %c0_22] : memref<3x128x256xbf16, #tpu.memory_space<vmem>>, vector<1x128x256xbf16>
    %56 = vector.shape_cast %55 : vector<1x128x256xbf16> to vector<128x256xbf16>
    %cst_23 = arith.constant dense<0.000000e+00> : vector<16x256xf32>
    %57 = tpu.matmul %54, %56, %cst_23 {dimension_numbers = #tpu.dot_dimension_numbers<[1], [0], [0], [1], [0, 0, 1, 1], [], []>} : vector<16x128xbf16>, vector<128x256xbf16>, vector<16x256xf32> -> vector<16x256xf32>
    %58 = arith.addf %53, %57 : vector<16x256xf32>
    %59 = vector.broadcast %2 : vector<1x256xf32> to vector<16x256xf32>
    %60 = arith.addf %58, %59 : vector<16x256xf32>
    %cst_24 = arith.constant 0.000000e+00 : f32
    %61 = vector.broadcast %cst_24 : f32 to vector<16x256xf32>
    %62 = arith.maximumf %60, %61 : vector<16x256xf32>
    %63 = arith.truncf %62 : vector<16x256xf32> to vector<16x256xbf16>
    %c0_25 = arith.constant 0 : index
    %c0_26 = arith.constant 0 : index
    %c0_27 = arith.constant 0 : index
    %64 = vector.load %arg5[%c0_25, %c0_26, %c0_27] : memref<1x256x128xbf16, #tpu.memory_space<vmem>>, vector<1x256x128xbf16>
    %65 = vector.shape_cast %64 : vector<1x256x128xbf16> to vector<256x128xbf16>
    %cst_28 = arith.constant dense<0.000000e+00> : vector<16x128xf32>
    %66 = tpu.matmul %63, %65, %cst_28 {dimension_numbers = #tpu.dot_dimension_numbers<[1], [0], [0], [1], [0, 0, 1, 1], [], []>} : vector<16x256xbf16>, vector<256x128xbf16>, vector<16x128xf32> -> vector<16x128xf32>
    %67 = vector.broadcast %3 : vector<1x128xf32> to vector<16x128xf32>
    %68 = arith.addf %66, %67 : vector<16x128xf32>
    %69 = arith.addf %68, %9 : vector<16x128xf32>
    %cst_29 = arith.constant dense<0.000000e+00> : vector<16xf32>
    %70 = vector.multi_reduction <add>, %69, %cst_29 [1] : vector<16x128xf32> to vector<16xf32>
    %71 = vector.shape_cast %70 : vector<16xf32> to vector<16x1xf32>
    %cst_30 = arith.constant 1.280000e+02 : f32
    %72 = vector.broadcast %cst_30 : f32 to vector<16x1xf32>
    %73 = arith.divf %71, %72 : vector<16x1xf32>
    %74 = vector.broadcast %73 : vector<16x1xf32> to vector<16x128xf32>
    %75 = arith.subf %69, %74 : vector<16x128xf32>
    %76 = arith.mulf %75, %75 : vector<16x128xf32>
    %cst_31 = arith.constant dense<0.000000e+00> : vector<16xf32>
    %77 = vector.multi_reduction <add>, %76, %cst_31 [1] : vector<16x128xf32> to vector<16xf32>
    %78 = vector.shape_cast %77 : vector<16xf32> to vector<16x1xf32>
    %cst_32 = arith.constant 1.280000e+02 : f32
    %79 = vector.broadcast %cst_32 : f32 to vector<16x1xf32>
    %80 = arith.divf %78, %79 : vector<16x1xf32>
    %81 = vector.broadcast %73 : vector<16x1xf32> to vector<16x128xf32>
    %82 = arith.subf %69, %81 : vector<16x128xf32>
    %cst_33 = arith.constant 9.99999974E-6 : f32
    %83 = vector.broadcast %cst_33 : f32 to vector<16x1xf32>
    %84 = arith.addf %80, %83 : vector<16x1xf32>
    %85 = math.rsqrt %84 : vector<16x1xf32>
    %86 = vector.broadcast %85 : vector<16x1xf32> to vector<16x128xf32>
    %87 = arith.mulf %82, %86 : vector<16x128xf32>
    %88 = vector.broadcast %0 : vector<1x128xf32> to vector<16x128xf32>
    %89 = arith.mulf %87, %88 : vector<16x128xf32>
    %90 = vector.broadcast %1 : vector<1x128xf32> to vector<16x128xf32>
    %91 = arith.addf %89, %90 : vector<16x128xf32>
    %c0_34 = arith.constant 0 : index
    %c0_35 = arith.constant 0 : index
    %c0_36 = arith.constant 0 : index
    %92 = vector.load %arg9[%c0_34, %c0_35, %c0_36] : memref<1x16x128xf32, #tpu.memory_space<vmem>>, vector<1x16x128xf32>
    %93 = vector.shape_cast %92 : vector<1x16x128xf32> to vector<16x128xf32>
    %94 = vector.shape_cast %91 : vector<16x128xf32> to vector<1x16x128xf32>
    tpu.vector_store %arg9[%c0_34, %c0_35, %c0_36], %94 {strides = array<i32>} : memref<1x16x128xf32, #tpu.memory_space<vmem>>, vector<1x16x128xf32>,
    return
  }
  func.func @transform_0(%arg0: i32, %arg1: i32) -> (i32, i32, i32) {
    %c0_i32 = arith.constant 0 : i32
    %c0_i32_0 = arith.constant 0 : i32
    %c0_i32_1 = arith.constant 0 : i32
    return %arg0, %c0_i32, %c0_i32_0 : i32, i32, i32
  }
  func.func @transform_1(%arg0: i32, %arg1: i32) -> (i32, i32, i32) {
    %c0_i32 = arith.constant 0 : i32
    %c0_i32_0 = arith.constant 0 : i32
    %c0_i32_1 = arith.constant 0 : i32
    %c0_i32_2 = arith.constant 0 : i32
    return %c0_i32, %c0_i32_0, %c0_i32_1 : i32, i32, i32
  }
  func.func @transform_2(%arg0: i32, %arg1: i32) -> (i32, i32) {
    %c0_i32 = arith.constant 0 : i32
    %c0_i32_0 = arith.constant 0 : i32
    %c0_i32_1 = arith.constant 0 : i32
    return %c0_i32, %c0_i32_0 : i32, i32
  }
  func.func @transform_3(%arg0: i32, %arg1: i32) -> (i32, i32, i32) {
    %c0_i32 = arith.constant 0 : i32
    %c0_i32_0 = arith.constant 0 : i32
    %c0_i32_1 = arith.constant 0 : i32
    %c0_i32_2 = arith.constant 0 : i32
    return %c0_i32, %c0_i32_0, %c0_i32_1 : i32, i32, i32
  }
  func.func @transform_4(%arg0: i32, %arg1: i32) -> (i32, i32) {
    %c0_i32 = arith.constant 0 : i32
    %c0_i32_0 = arith.constant 0 : i32
    %c0_i32_1 = arith.constant 0 : i32
    return %c0_i32, %c0_i32_0 : i32, i32
  }
  func.func @transform_5(%arg0: i32, %arg1: i32) -> (i32, i32) {
    %c0_i32 = arith.constant 0 : i32
    %c0_i32_0 = arith.constant 0 : i32
    %c0_i32_1 = arith.constant 0 : i32
    return %c0_i32, %c0_i32_0 : i32, i32
  }
  func.func @transform_6(%arg0: i32, %arg1: i32) -> (i32, i32) {
    %c0_i32 = arith.constant 0 : i32
    %c0_i32_0 = arith.constant 0 : i32
    %c0_i32_1 = arith.constant 0 : i32
    return %c0_i32, %c0_i32_0 : i32, i32
  }
  func.func @transform_7(%arg0: i32, %arg1: i32) -> (i32, i32, i32) {
    %c0_i32 = arith.constant 0 : i32
    %c0_i32_0 = arith.constant 0 : i32
    return %arg0, %arg1, %c0_i32 : i32, i32, i32
  }
}

</mosaic_0001>

<bundles_post_ra>
// kernel: position_wise_ffn.1
= control target key start
LH: loop header
LB: loop body
LE: loop exit
PB: predicated region body
PF: predicated region fallthrough
CT: control target
= control target key end

     0   :  { %s1516_s24 = smov 0   ;;  %s1518_s25 = smov 0   ;;  %s1848_s0 = inlined_call_operand.vmem [shape: f32[2,56,128], index: 0, kind: input, shape index: {}]   ;;  %s1849_s1 = inlined_call_operand.vmem [shape: bf16[3,128,256], index: 1, kind: input, shape index: {}]   ;;  %s1850_s2 = inlined_call_operand.vmem [shape: f32[1,256], index: 2, kind: input, shape index: {}]   ;;  %s1851_s3 = inlined_call_operand.vmem [shape: bf16[1,256,128], index: 3, kind: input, shape index: {}]   ;;  %s1852_s4 = inlined_call_operand.vmem [shape: f32[1,128], index: 4, kind: input, shape index: {}]   ;;  %s1853_s5 = inlined_call_operand.vmem [shape: f32[1,128], index: 5, kind: input, shape index: {}]   ;;  %s1854_s6 = inlined_call_operand.vmem [shape: f32[1,128], index: 6, kind: input, shape index: {}]   ;;  %s1855_s7 = inlined_call_operand.vmem [shape: f32[2,48,128], index: 7, kind: output, shape index: {}]  }
   0x1   :  { %s1520_s26 = smov 0   ;;  %s1522_s27 = smov 0  }
   0x2   :  { %s1524_s28 = smov 0  }
   0x3 LB: > { %s26_s29 = sadd.s32 1, %s1465_s26  ;;  %s29_s30 = sadd.s32 1, %s1469_s27  ;;  %s1473_s28 = sphi %s1524_s28, %s17_s28   ;;  %s1469_s27 = sphi %s1522_s27, %s1861_s27   ;;  %s1465_s26 = sphi %s1520_s26, %s1860_s26   ;;  %s1461_s25 = sphi %s1518_s25, %s1859_s25   ;;  %s1457_s24 = sphi %s1516_s24, %s1858_s24  }
   0x4   : > { %p27_p0 = scmp.ge.s32.totalorder %s26_s29, 3  ;;  %p1163_p1 = scmp.ge.s32.totalorder %s1473_s28, 1 }
   0x5   : > { %p251_p2 = scmp.lt.s32.totalorder %s1473_s28, 7 }
   0x6   : > { %s1863_s29 = smov (%p27_p0, %s26_s29), 0  ;;  %s1865_s30 = smov (!%p27_p0, %s29_s30), %s1469_s27 }
   0x7   : > { %p252_p3 = pnand %p1163_p1, %p251_p2  ;;  %p31_p4 = scmp.ge.s32.totalorder %s1865_s30, 2 }
   0x8   : > { %p287_p5 = scmp.lt.s32.totalorder (!%p252_p3), %s1461_s25, 1  ;;  %s1167_s9 = sshll.u32 (!%p252_p3), %s1457_s24, 4 }
   0x9   : > { %s1867_s30 = smov (%p31_p4, %s1865_s30), 0  ;;  %255 = sbr.rel (%p252_p3) target bundleno = 1093 (0x445), region = 48 }
   0xa   : > { %s1165_s10 = sshll.u32 (!%p252_p3), %s1457_s24, 1 }
   0xb   : > { %p295_p6 = scmp.lt.s32.totalorder (!%p252_p3), %s1165_s10, 5 }
   0xe   : > { %s1869_s25 = smov (!%p287_p5, %s1461_s25), 1  ;;  %v1337_v3 = vld [vmem:[%s1849_s1 + $0x74] ss:$8 sps:$4 sm:$0xff]   ;;  %v1339_v4 = vld [vmem:[%s1849_s1 + $0x70] ss:$8 sps:$4 sm:$0xff]   ;;  %v1475_v37 = vmov 0   ;;  %v364_v58 = vlaneseq  ;;  %v368_v62 = vstv %s1167_s9 }
   0xf   : > { %s1294_s8 = smul.u32 56, %s1869_s25  ;;  %642 = vmatprep.subr.bf16.mxu1 %v1337_v3  ;;  %v1340_v17 = vld [vmem:[%s1849_s1 + $0x64] ss:$8 sps:$4 sm:$0xff]   ;;  %v1342_v18 = vld [vmem:[%s1849_s1 + $0x60] ss:$8 sps:$4 sm:$0xff]   ;;  %674 = vmatprep.mubr.bf16.mxu1 %v1475_v37  ;;  %vm704_vm11 = vcmask 1046528  }
  0x10   : > { %643 = vmatpush1.bf16.msra.mxu1 %v1339_v4  ;;  %v1343_v19 = vld [vmem:[%s1849_s1 + $0xf4] ss:$8 sps:$4 sm:$0xff]   ;;  %v1345_v20 = vld [vmem:[%s1849_s1 + $0xf0] ss:$8 sps:$4 sm:$0xff]   ;;  %v1349_v23 = vld [vmem:[%s1849_s1 + $0xe4] ss:$8 sps:$4 sm:$0xff]   ;;  %551 = vmatprep.mubr.bf16.mxu0 %v1475_v37 }
  0x11   : > { %s291_s12 = scalar_lea.vmem %s1848_s0, %s1294_s8  ;;  %644 = vmatprep.subr.bf16.mxu1 %v1340_v17  ;;  %v1346_v21 = vld [vmem:[%s1849_s1 + $0x54] ss:$8 sps:$4 sm:$0xff]   ;;  %519 = vmatprep.subr.bf16.mxu0 %v1343_v19  ;;  %v1348_v22 = vld [vmem:[%s1849_s1 + $0x50] ss:$8 sps:$4 sm:$0xff]   ;;  %v1351_v24 = vld [vmem:[%s1849_s1 + $0xe0] ss:$8 sps:$4 sm:$0xff]  }
  0x12   : > { %s308_s13 = scalar_lea.vmem %s291_s12, %s1167_s9  ;;  %520 = vmatpush1.bf16.msra.mxu0 %v1345_v20  ;;  %v1352_v25 = vld [vmem:[%s1849_s1 + $0x44] ss:$8 sps:$4 sm:$0xff]   ;;  %v1354_v26 = vld [vmem:[%s1849_s1 + $0x40] ss:$8 sps:$4 sm:$0xff]   ;;  %v1355_v27 = vld [vmem:[%s1849_s1 + $0xd4] ss:$8 sps:$4 sm:$0xff]  }
  0x13   : > { %v1557_v0 = vld [vmem:[%s308_s13] sm:$0xff]  ;;  %v1559_v1 = vld [vmem:[%s308_s13 + $0x10] sm:$0xff]  ;;  %v1561_v2 = vld [vmem:[%s308_s13 + $0x8] sm:$0xff]  ;;  %521 = vmatprep.subr.bf16.mxu0 %v1349_v23  ;;  %v1682_v59 = vshrl.u32 %v364_v58, 7  ;;  %vm425_vm10 = vsmask.f32 7424 }
  0x14   : > { %312 = vadd.xlane.f32.xlu0 %v1557_v0  ;;  %316 = vadd.xlane.f32.xlu1 %v1559_v1  ;;  %v1358_v28 = vld [vmem:[%s1849_s1 + $0x34] ss:$8 sps:$4 sm:$0xff]   ;;  %v1357_v29 = vld [vmem:[%s1849_s1 + $0xd0] ss:$8 sps:$4 sm:$0xff]   ;;  %v1361_v31 = vld [vmem:[%s1849_s1 + $0xc4] ss:$8 sps:$4 sm:$0xff]  }
  0x15   : > { %645 = vmatpush1.bf16.msra.mxu1 %v1342_v18  ;;  %v1360_v30 = vld [vmem:[%s1849_s1 + $0x30] ss:$8 sps:$4 sm:$0xff]   ;;  %v1364_v32 = vld [vmem:[%s1849_s1 + $0x24] ss:$8 sps:$4 sm:$0xff]   ;;  %v1363_v33 = vld [vmem:[%s1849_s1 + $0xc0] ss:$8 sps:$4 sm:$0xff]  }
  0x16   : > { %646 = vmatprep.subr.bf16.mxu1 %v1346_v21  ;;  %522 = vmatpush1.bf16.msra.mxu0 %v1351_v24  ;;  %v1366_v34 = vld [vmem:[%s1849_s1 + $0x20] ss:$8 sps:$4 sm:$0xff]   ;;  %v1367_v35 = vld [vmem:[%s1849_s1 + $0xb4] ss:$8 sps:$4 sm:$0xff]   ;;  %v1369_v38 = vld [vmem:[%s1849_s1 + $0xb0] ss:$8 sps:$4 sm:$0xff]  }
  0x17   : > { %523 = vmatprep.subr.bf16.mxu0 %v1355_v27  ;;  %v1370_v36 = vld [vmem:[%s1849_s1 + $0x14] ss:$8 sps:$4 sm:$0xff]   ;;  %v1372_v39 = vld [vmem:[%s1849_s1 + $0x10] ss:$8 sps:$4 sm:$0xff]   ;;  %v1373_v40 = vld [vmem:[%s1849_s1 + $0xa4] ss:$8 sps:$4 sm:$0xff]  }
  0x18   : > { %314 = vadd.xlane.f32.xlu0 %v1561_v2  ;;  %v1376_v41 = vld [vmem:[%s1849_s1 + $0x4] ss:$8 sps:$4 sm:$0xff]   ;;  %v1375_v42 = vld [vmem:[%s1849_s1 + $0xa0] ss:$8 sps:$4 sm:$0xff]   ;;  %v1379_v44 = vld [vmem:[%s1849_s1 + $0x94] ss:$8 sps:$4 sm:$0xff]  }
  0x19   : > { %647 = vmatpush1.bf16.msra.mxu1 %v1348_v22  ;;  %v1378_v43 = vld [vmem:[%s1849_s1] ss:$8 sps:$4 sm:$0xff]   ;;  %v1381_v45 = vld [vmem:[%s1849_s1 + $0x90] ss:$8 sps:$4 sm:$0xff]   ;;  %v1382_v46 = vld [vmem:[%s1849_s1 + $0x84] ss:$8 sps:$4 sm:$0xff]  }
  0x1a   : > { %648 = vmatprep.subr.bf16.mxu1 %v1352_v25  ;;  %524 = vmatpush1.bf16.msra.mxu0 %v1357_v29  ;;  %v1384_v47 = vld [vmem:[%s1849_s1 + $0x80] ss:$8 sps:$4 sm:$0xff]   ;;  %v1387_v48 = vld [vmem:[%s1849_s1 + $0x174] ss:$8 sps:$4 sm:$0xff]   ;;  %v366_v60 = vadd.s32 8, %v1682_v59  ;;  %v367_v61 = vadd.s32 16, %v1682_v59 }
  0x1b   : > { %525 = vmatprep.subr.bf16.mxu0 %v1361_v31  ;;  %v1416_v58 = vld [vmem:[%s1851_s3 + $0x20] sm:$0xff]   ;;  %s1871_s10 = smov (!%p295_p6, %s1165_s10), 5  ;;  %s1295_s11 = smul.u32 6, %s1869_s25 }
  0x1c   : > { %v370_v3 = vadd.s32 %v368_v62, %v366_v60  ;;  %v371_v4 = vadd.s32 %v368_v62, %v367_v61  ;;  %v1417_v60 = vld [vmem:[%s1851_s3 + $0x58] sm:$0xff]  }
  0x1d   : > { %649 = vmatpush1.bf16.msra.mxu1 %v1354_v26  ;;  %v1418_v61 = vld [vmem:[%s1851_s3 + $0x18] sm:$0xff]   ;;  %s298_s12 = sadd.s32 %s1295_s11, %s1871_s10 }
  0x1e   : > { %650 = vmatprep.subr.bf16.mxu1 %v1358_v28  ;;  %526 = vmatpush1.bf16.msra.mxu0 %v1363_v33  ;;  %vm373_vm0 = vcmp.ge.s32.totalorder %v370_v3, 1  ;;  %vm376_vm1 = vcmp.lt.s32.totalorder %v370_v3, 41  ;;  %vm374_vm2 = vcmp.ge.s32.totalorder %v371_v4, 1  ;;  %vm377_vm3 = vcmp.lt.s32.totalorder %v371_v4, 41  ;;  %v1390_v33 = vld [vmem:[%s1849_s1 + $0x164] ss:$8 sps:$4 sm:$0xff]  }
  0x1f   : > { %527 = vmatprep.subr.bf16.mxu0 %v1367_v35  ;;  %vm1703_vm6 = vmand %vm373_vm0, %vm376_vm1  ;;  %v1388_v35 = vld [vmem:[%s1849_s1 + $0x160] ss:$8 sps:$4 sm:$0xff]   ;;  %s1166_s13 = sshll.u32 %s298_s12, 3 }
  0x20   : > { %vm380_vm7 = vmand %vm374_vm2, %vm377_vm3  ;;  %v1421_v3 = vld [vmem:[%s1851_s3 + $0x48] sm:$0xff]   ;;  %s300_s16 = scalar_lea.vmem %s1855_s7, %s1166_s13 }
  0x21   : > { %651 = vmatpush1.bf16.msra.mxu1 %v1360_v30  ;;  %v1385_v30 = vld [vmem:[%s1849_s1 + $0x170] ss:$8 sps:$4 sm:$0xff]   ;;  %v1422_v4 = vld [vmem:[%s1851_s3 + $0x8] sm:$0xff]  }
  0x22   : > { %652 = vmatprep.subr.bf16.mxu1 %v1364_v32  ;;  %528 = vmatpush1.bf16.msra.mxu0 %v1369_v38  ;;  %v1391_v38 = vld [vmem:[%s1849_s1 + $0x150] ss:$8 sps:$4 sm:$0xff]  }
  0x23   : > { %529 = vmatprep.subr.bf16.mxu0 %v1373_v40  ;;  %v1399_v40 = vld [vmem:[%s1849_s1 + $0x134] ss:$8 sps:$4 sm:$0xff]  }
  0x25   : > { %653 = vmatpush1.bf16.msra.mxu1 %v1366_v34 }
  0x26   : > { %654 = vmatprep.subr.bf16.mxu1 %v1370_v36  ;;  %530 = vmatpush1.bf16.msra.mxu0 %v1375_v42  ;;  %v1393_v36 = vld [vmem:[%s1849_s1 + $0x154] ss:$8 sps:$4 sm:$0xff]   ;;  %v1402_v42 = vld [vmem:[%s1849_s1 + $0x124] ss:$8 sps:$4 sm:$0xff]  }
  0x27   : > { %531 = vmatprep.subr.bf16.mxu0 %v1379_v44  ;;  %v1405_v44 = vld [vmem:[%s1849_s1 + $0x114] ss:$8 sps:$4 sm:$0xff]  }
  0x29   : > { %655 = vmatpush1.bf16.msra.mxu1 %v1372_v39  ;;  %v1396_v39 = vld [vmem:[%s1849_s1 + $0x144] ss:$8 sps:$4 sm:$0xff]  }
  0x2a   : > { %656 = vmatprep.subr.bf16.mxu1 %v1376_v41  ;;  %532 = vmatpush1.bf16.msra.mxu0 %v1381_v45  ;;  %v1397_v41 = vld [vmem:[%s1849_s1 + $0x130] ss:$8 sps:$4 sm:$0xff]  }
  0x2b   : > { %533 = vmatprep.subr.bf16.mxu0 %v1382_v46  ;;  %v1403_v45 = vld [vmem:[%s1849_s1 + $0x110] ss:$8 sps:$4 sm:$0xff]   ;;  %v1408_v46 = vld [vmem:[%s1849_s1 + $0x104] ss:$8 sps:$4 sm:$0xff]  }
  0x2d   : > { %657 = vmatpush1.bf16.msra.mxu1 %v1378_v43  ;;  %v1400_v43 = vld [vmem:[%s1849_s1 + $0x120] ss:$8 sps:$4 sm:$0xff]  }
  0x2e   : > { %534 = vmatpush1.bf16.msra.mxu0 %v1384_v47  ;;  %v1406_v47 = vld [vmem:[%s1849_s1 + $0x100] ss:$8 sps:$4 sm:$0xff]  }
  0x2f   : > { %789 = vmatprep.subr.bf16.mxu0 %v1387_v48 }
  0x9d   : > { %v313_v5 = vpop.xlane.xlu0 %312  ;;  %v317_v6 = vpop.xlane.xlu1 %316 }
  0x9e   : > { %v319_v7 = vmul.f32 0.0078125, %v313_v5  ;;  %v321_v8 = vmul.f32 0.0078125, %v317_v6  ;;  %v1691_v5 = vld [vmem:[%s1853_s5] ss:$0 sm:$0xff] }
  0xa0   : > { %v1573_v9 = vsub.f32 %v1557_v0, %v319_v7  ;;  %v1576_v10 = vsub.f32 %v1559_v1, %v321_v8  ;;  %v369_v7 = vadd.s32 %v368_v62, %v1682_v59  ;;  %v1419_v62 = vld [vmem:[%s1851_s3 + $0x50] sm:$0xff]  }
  0xa1   : > { %v315_v11 = vpop.xlane.xlu0 %314 }
  0xa2   : > { %v320_v12 = vmul.f32 0.0078125, %v315_v11  ;;  %v325_v13 = vmul.f32 %v1573_v9, %v1573_v9  ;;  %v327_v15 = vmul.f32 %v1576_v10, %v1576_v10  ;;  %vm372_vm4 = vcmp.ge.s32.totalorder %v369_v7, 1 }
  0xa3   : > { %vm375_vm5 = vcmp.lt.s32.totalorder %v369_v7, 41  ;;  %v1424_v7 = vld [vmem:[%s1851_s3] sm:$0xff]  }
  0xa4   : > { %v1581_v14 = vsub.f32 %v1561_v2, %v320_v12  ;;  %328 = vadd.xlane.f32.xlu1 %v325_v13  ;;  %v1699_v13 = vld [vmem:[%s1854_s6] ss:$0 sm:$0xff]  ;;  %vm378_vm8 = vmand %vm372_vm4, %vm375_vm5 }
  0xa5   : > { %vm1218_vm9 = vmpackc.low %vm1703_vm6, %vm378_vm8 }
  0xa6   : > { %v326_v16 = vmul.f32 %v1581_v14, %v1581_v14 }
  0xa8   : > { %332 = vadd.xlane.f32.xlu1 %v327_v15  ;;  %330 = vadd.xlane.f32.xlu0 %v326_v16 }
 0x12d   : > { %v329_v49 = vpop.xlane.xlu1 %328 }
 0x12e   : > { %v334_v50 = vmul.f32 0.0078125, %v329_v49 }
 0x130   : > { %v337_v51 = vadd.f32 1e-05, %v334_v50 }
 0x131   : > { %v333_v52 = vpop.xlane.xlu1 %332  ;;  %v331_v53 = vpop.xlane.xlu0 %330 }
 0x132   : > { %1425 = vrsqrt.f32 %v337_v51  ;;  %v336_v54 = vmul.f32 0.0078125, %v333_v52  ;;  %v335_v55 = vmul.f32 0.0078125, %v331_v53  ;;  %v1409_v51 = vld [vmem:[%s1851_s3 + $0x78] sm:$0xff]   ;;  %v1411_v53 = vld [vmem:[%s1851_s3 + $0x70] sm:$0xff]  }
 0x133   : > { %v1410_v52 = vld [vmem:[%s1851_s3 + $0x38] sm:$0xff]   ;;  %1272 = vmatprep.subr.bf16.mxu1 %v1409_v51 }
 0x134   : > { %v339_v56 = vadd.f32 1e-05, %v336_v54  ;;  %v338_v57 = vadd.f32 1e-05, %v335_v55  ;;  %v1412_v54 = vld [vmem:[%s1851_s3 + $0x30] sm:$0xff]   ;;  %v1413_v55 = vld [vmem:[%s1851_s3 + $0x68] sm:$0xff]  }
 0x136   : > { %1427 = vrsqrt.f32 %v339_v56  ;;  %v1414_v56 = vld [vmem:[%s1851_s3 + $0x28] sm:$0xff]  }
 0x137   : > { %1429 = vrsqrt.f32 %v338_v57  ;;  %v1415_v57 = vld [vmem:[%s1851_s3 + $0x60] sm:$0xff]  }
 0x13f   : > { %v1426_v63 = vpop.eup %1425 }
 0x140   : > { %v343_v6 = vmul.f32 %v1426_v63, %v1573_v9  ;;  %v1420_v63 = vld [vmem:[%s1851_s3 + $0x10] sm:$0xff]  }
 0x142   : > { %v352_v11 = vmul.f32 %v1691_v5, %v343_v6  ;;  %v1423_v6 = vld [vmem:[%s1851_s3 + $0x40] sm:$0xff]  }
 0x143   : > { %v1428_v8 = vpop.eup %1427 }
 0x144   : > { %v1430_v12 = vpop.eup %1429  ;;  %v345_v15 = vmul.f32 %v1428_v8, %v1576_v10  ;;  %v361_v19 = vadd.f32 %v1699_v13, %v352_v11 }
 0x145   : > { %v344_v16 = vmul.f32 %v1430_v12, %v1581_v14 }
 0x146   : > { %v354_v17 = vmul.f32 %v1691_v5, %v345_v15  ;;  %v387_v21 = vsel %vm378_vm8, %v361_v19, 0.0 }
 0x147   : > { %v353_v18 = vmul.f32 %v1691_v5, %v344_v16 }
 0x148   : > { %v363_v20 = vadd.f32 %v1699_v13, %v354_v17  ;;  %v843_v17 = vsub.s32 1, %v1682_v59 }
 0x149   : > { %v362_v10 = vadd.f32 %v1699_v13, %v353_v18 }
 0x14a   : > { %v389_v14 = vsel %vm380_vm7, %v363_v20, 0.0  ;;  %v839_v20 = vsub.s32 0, %v1682_v59 }
 0x14b   : > { %v388_v22 = vsel %vm1703_vm6, %v362_v10, 0.0  ;;  %v1219_v23 = vpack.c.bf16 %v362_v10, %v361_v19  ;;  %v391_v24 = vpack.c.bf16 %v389_v14, %v389_v14  ;;  %v305_v14 = vld [vmem:[%s1850_s2] sm:$0x3] }
 0x14c   : > { %v390_v25 = vpack.c.bf16 %v388_v22, %v387_v21 }
 0x14d   : > { %1220 = vmatmul.mubr.msk.bf16.vlgmr.msra.gmra.mxu1 %vm1218_vm9, %v1219_v23  ;;  %v434_v27 = vshll.u32 %v391_v24, 16  ;;  %v706_v49 = vrot.slane %v391_v24, 1 }
 0x14e   : > { %v429_v26 = vshll.u32 %v390_v25, 16  ;;  %v427_v28 = vshrl.u32 %v390_v25, 16  ;;  %v705_v48 = vrot.slane %v390_v25, 1  ;;  %1273 = vmatpush3.bf16.msra.mxu1 %v1410_v52  ;;  %v844_v25 = vrot.slane %v305_v14, %v843_v17 }
 0x14f   : > { %v436_v32 = vrot.slane %v434_v27, 1  ;;  %1274 = vmatprep.subr.bf16.mxu1 %v1411_v53 }
 0x150   : > { %v431_v29 = vrot.slane %v429_v26, 1  ;;  %v707_v50 = vsel %vm704_vm11, %v705_v48, %v706_v49  ;;  %v1039_v49 = vrot.slane %v1559_v1, 1 }
 0x152   : > { %v432_v31 = vor.u32 %v431_v29, %v427_v28  ;;  %1275 = vmatpush3.bf16.msra.mxu1 %v1412_v54  ;;  %v840_v28 = vrot.slane %v305_v14, %v839_v20 }
 0x153   : > { %1276 = vmatprep.subr.bf16.mxu1 %v1413_v55 }
 0x154   : > { %v437_v34 = vsel %vm425_vm10, %v432_v31, %v436_v32 }
 0x155   : > { %552 = vmatmul.mubr.bf16.vlgmr.msra.gmra.mxu0 %v437_v34 }
 0x156   : > { %790 = vmatpush1.bf16.msra.mxu0 %v1385_v30  ;;  %821 = vmatprep.mubr.bf16.mxu0 %v1475_v37  ;;  %v1394_v37 = vld [vmem:[%s1849_s1 + $0x140] ss:$8 sps:$4 sm:$0xff]  }
 0x157   : > { %791 = vmatprep.subr.bf16.mxu0 %v1390_v33  ;;  %1277 = vmatpush3.bf16.msra.mxu1 %v1414_v56 }
 0x158   : > { %1278 = vmatprep.subr.bf16.mxu1 %v1415_v57 }
 0x15a   : > { %792 = vmatpush1.bf16.msra.mxu0 %v1388_v35 }
 0x15b   : > { %793 = vmatprep.subr.bf16.mxu0 %v1393_v36  ;;  %1279 = vmatpush3.bf16.msra.mxu1 %v1416_v58 }
 0x15c   : > { %1280 = vmatprep.subr.bf16.mxu1 %v1417_v60 }
 0x15e   : > { %794 = vmatpush1.bf16.msra.mxu0 %v1391_v38 }
 0x15f   : > { %795 = vmatprep.subr.bf16.mxu0 %v1396_v39  ;;  %1281 = vmatpush3.bf16.msra.mxu1 %v1418_v61 }
 0x160   : > { %1282 = vmatprep.subr.bf16.mxu1 %v1419_v62 }
 0x162   : > { %796 = vmatpush1.bf16.msra.mxu0 %v1394_v37 }
 0x163   : > { %797 = vmatprep.subr.bf16.mxu0 %v1399_v40  ;;  %1283 = vmatpush3.bf16.msra.mxu1 %v1420_v63 }
 0x164   : > { %1284 = vmatprep.subr.bf16.mxu1 %v1421_v3 }
 0x166   : > { %798 = vmatpush1.bf16.msra.mxu0 %v1397_v41 }
 0x167   : > { %799 = vmatprep.subr.bf16.mxu0 %v1402_v42  ;;  %1285 = vmatpush3.bf16.msra.mxu1 %v1422_v4 }
 0x168   : > { %1286 = vmatprep.subr.bf16.mxu1 %v1423_v6 }
 0x16a   : > { %800 = vmatpush1.bf16.msra.mxu0 %v1400_v43  ;;  %v1036_v43 = vrot.slane %v1557_v0, 1 }
 0x16b   : > { %801 = vmatprep.subr.bf16.mxu0 %v1405_v44  ;;  %1287 = vmatpush3.bf16.msra.mxu1 %v1424_v7  ;;  %v1037_v44 = vrot.slane %v1561_v2, 1 }
 0x16d   : > { %v1038_v51 = vsel %vm704_vm11, %v1036_v43, %v1037_v44  ;;  %v1040_v0 = vsel %vm704_vm11, %v1037_v44, %v1039_v49 }
 0x16e   : > { %802 = vmatpush1.bf16.msra.mxu0 %v1403_v45 }
 0x16f   : > { %803 = vmatprep.subr.bf16.mxu0 %v1408_v46  ;;  %v1253_v46 = vld [vmem:[%s1852_s4] ss:$0 sm:$0xff] }
 0x172   : > { %804 = vmatpush1.bf16.msra.mxu0 %v1406_v47 }
 0x175   : > { %822 = vmatmul.mubr.bf16.vlgmr.msra.gmra.mxu0 %v707_v50 }
 0x20d   : > { %v676_v12 = vpop.f32.mrf.mxu1 }
 0x20f   : > { %v678_v16 = vpop.f32.mrf.mxu1 }
 0x211   : > { %v680_v18 = vpop.f32.mrf.mxu1 }
 0x213   : > { %v682_v26 = vpop.f32.mrf.mxu1 }
 0x215   : > { %v553_v8 = vpop.f32.mrf.mxu0 }
 0x216   : > { %v677_v21 = vadd.f32 %v676_v12, %v553_v8 }
 0x217   : > { %v555_v11 = vpop.f32.mrf.mxu0 }
 0x218   : > { %v679_v10 = vadd.f32 %v678_v16, %v555_v11 }
 0x219   : > { %v557_v15 = vpop.f32.mrf.mxu0 }
 0x21a   : > { %v681_v23 = vadd.f32 %v680_v18, %v557_v15 }
 0x21b   : > { %v559_v9 = vpop.f32.mrf.mxu0 }
 0x21c   : > { %v683_v30 = vadd.f32 %v682_v26, %v559_v9 }
 0x235   : > { %v823_v19 = vpop.f32.mrf.mxu0 }
 0x236   : > { %v832_v27 = vadd.f32 %v823_v19, %v677_v21 }
 0x237   : > { %v825_v22 = vpop.f32.mrf.mxu0 }
 0x238   : > { %v833_v24 = vadd.f32 %v825_v22, %v679_v10  ;;  %v847_v35 = vadd.f32 %v840_v28, %v832_v27 }
 0x239   : > { %v827_v29 = vpop.f32.mrf.mxu0 }
 0x23a   : > { %v834_v31 = vadd.f32 %v827_v29, %v681_v23  ;;  %v848_v33 = vadd.f32 %v844_v25, %v833_v24  ;;  %v851_v40 = vmax.f32 %v847_v35, 0.0 }
 0x23b   : > { %v829_v32 = vpop.f32.mrf.mxu0 }
 0x23c   : > { %v849_v34 = vadd.f32 %v840_v28, %v834_v31  ;;  %v835_v59 = vadd.f32 %v829_v32, %v683_v30  ;;  %v852_v39 = vmax.f32 %v848_v33, 0.0 }
 0x23e   : > { %v850_v36 = vadd.f32 %v844_v25, %v835_v59  ;;  %v853_v38 = vmax.f32 %v849_v34, 0.0 }
 0x240   : > { %v854_v37 = vmax.f32 %v850_v36, 0.0  ;;  %v855_v42 = vpack.c.bf16 %v853_v38, %v851_v40 }
 0x242   : > { %v856_v41 = vpack.c.bf16 %v854_v37, %v852_v39 }
 0x244   : > { %1023 = vmatprep.mubr.bf16.mxu1 %v856_v41 }
 0x245   : > { %1024 = vmatmul.mubr.bf16.vlgmr.msra.gmra.mxu1 %v855_v42 }
 0x305   : > { %v1288_v45 = vpop.f32.mrf.mxu1 }
 0x307   : > { %v1289_v47 = vpop.f32.mrf.mxu1 }
 0x308   : > { %v1290_v48 = vadd.f32 %v1289_v47, %v1288_v45 }
 0x309   : > { %v1291_v50 = vpop.f32.mrf.mxu1 }
 0x30a   : > { %v1026_v52 = vadd.f32 %v1290_v48, %v1253_v46 }
 0x30b   : > { %v1292_v53 = vpop.f32.mrf.mxu1 }
 0x30c   : > { %v1293_v54 = vadd.f32 %v1292_v53, %v1291_v50  ;;  %v1043_v55 = vadd.f32 %v1038_v51, %v1026_v52 }
 0x30e   : > { %v1029_v56 = vadd.f32 %v1293_v54, %v1253_v46  ;;  %1045 = vadd.xlane.f32.xlu0 %v1043_v55 }
 0x310   : > { %v1044_v2 = vadd.f32 %v1040_v0, %v1029_v56 }
 0x312   : > { %1047 = vadd.xlane.f32.xlu1 %v1044_v2 }
 0x397   : > { %v1046_v57 = vpop.xlane.xlu0 %1045 }
 0x398   : > { %v1049_v58 = vmul.f32 0.0078125, %v1046_v57 }
 0x39a   : > { %v1051_v60 = vsub.f32 %v1043_v55, %v1049_v58 }
 0x39b   : > { %v1048_v61 = vpop.xlane.xlu1 %1047 }
 0x39c   : > { %v1050_v62 = vmul.f32 0.0078125, %v1048_v61  ;;  %v1053_v1 = vmul.f32 %v1051_v60, %v1051_v60 }
 0x39e   : > { %v1052_v63 = vsub.f32 %v1044_v2, %v1050_v62  ;;  %1055 = vadd.xlane.f32.xlu0 %v1053_v1 }
 0x3a0   : > { %v1054_v3 = vmul.f32 %v1052_v63, %v1052_v63 }
 0x3a2   : > { %1057 = vadd.xlane.f32.xlu1 %v1054_v3 }
 0x427   : > { %v1056_v4 = vpop.xlane.xlu0 %1055 }
 0x428   : > { %v1059_v6 = vmul.f32 0.0078125, %v1056_v4 }
 0x42a   : > { %v1061_v7 = vadd.f32 1e-05, %v1059_v6 }
 0x42b   : > { %v1058_v8 = vpop.xlane.xlu1 %1057 }
 0x42c   : > { %1431 = vrsqrt.f32 %v1061_v7  ;;  %v1060_v11 = vmul.f32 0.0078125, %v1058_v8 }
 0x42e   : > { %v1062_v12 = vadd.f32 1e-05, %v1060_v11 }
 0x430   : > { %1433 = vrsqrt.f32 %v1062_v12 }
 0x439   : > { %v1432_v15 = vpop.eup %1431 }
 0x43a   : > { %v1065_v16 = vmul.f32 %v1432_v15, %v1051_v60 }
 0x43c   : > { %v1067_v9 = vmul.f32 %v1691_v5, %v1065_v16 }
 0x43d   : > { %v1434_v17 = vpop.eup %1433 }
 0x43e   : > { %v1069_v18 = vadd.f32 %v1699_v13, %v1067_v9  ;;  %v1066_v19 = vmul.f32 %v1434_v17, %v1052_v63 }
 0x440   : > { %1071 = vst [vmem:[%s300_s16] sm:$0xff] %v1069_v18  ;;  %v1068_v20 = vmul.f32 %v1691_v5, %v1066_v19 }
 0x442   : > { %v1070_v10 = vadd.f32 %v1699_v13, %v1068_v20 }
 0x444   : > { %1072 = vst [vmem:[%s300_s16 + $0x8] sm:$0xff] %v1070_v10 }
 0x445 PF: > { %s17_s28 = sadd.s32 1, %s1473_s28   ;;  %s1858_s24 = smov %s1465_s26 }
 0x446   : > { %p14_p7 = scmp.ge.s32.totalorder %s17_s28, 8   ;;  %s1859_s25 = smov %s1469_s27 }
 0x447   : > { %s1860_s26 = smov %s1863_s29  ;;  %s1861_s27 = smov %s1867_s30 }
 0x448   :  { %16 = sbr.rel (!%p14_p7) target bundleno = 3 (0x3), region = 81 }

</bundles_post_ra>
